<compile_context>
chip_gen: v7x
topology: tpu7x:2x2x1
jax: 0.10.0
libtpu: 0.0.40
codegen_flags: <defaults>
</compile_context>

<pallas_src>
import jax
import jax.numpy as jnp
from jax.experimental import pallas as pl
from jax.experimental.pallas import tpu as pltpu


def _gnn_kernel(e_ref, wee_ref, weh_ref, be_ref,
                w12_ref, b12_ref, uz_ref, um_ref, ub_ref,
                dz_ref, dh_ref, db_ref,
                y_ref, h_scr):
    TB, K, F = e_ref.shape          # batch tile, nodes, raw features (=2)
    D = wee_ref.shape[1]            # enc_size
    H = ub_ref.shape[1]             # hidden_size
    R = TB * K
    bf16 = jnp.bfloat16

    t = pl.program_id(1)

    # h starts at zero at the beginning of every batch tile's time loop.
    @pl.when(t == 0)
    def _():
        h_scr[...] = jnp.zeros_like(h_scr)

    # ---- z = enc(cat(E[t], h)) : concat split into two matmuls -------------
    x_e = e_ref[...].reshape(R, F).astype(bf16)              # (R, 2)
    x_h = h_scr[...].reshape(R, H).astype(bf16)              # (R, H)
    z = (jnp.dot(x_e, wee_ref[...], preferred_element_type=jnp.float32)
         + jnp.dot(x_h, weh_ref[...], preferred_element_type=jnp.float32)
         + be_ref[...])                                      # (R, D) f32
    zb = z.astype(bf16)

    # ---- GnnProc: M1 and M2 fused into one (D, 2D) matmul ------------------
    m12 = (jnp.dot(zb, w12_ref[...], preferred_element_type=jnp.float32)
           + b12_ref[...])                                   # (R, 2D) f32
    m1z = m12[:, :D].reshape(TB, K, D)
    m2z = m12[:, D:].reshape(TB, K, D)
    mx = jnp.max(m2z, axis=1, keepdims=True)                 # max over nodes K
    m = jnp.maximum(m1z + mx, 0.0)                           # (TB, K, D)
    mb = m.reshape(R, D).astype(bf16)

    # ---- h = relu(U(cat(z, m))) : concat split into two matmuls ------------
    h_new = (jnp.dot(zb, uz_ref[...], preferred_element_type=jnp.float32)
             + jnp.dot(mb, um_ref[...], preferred_element_type=jnp.float32)
             + ub_ref[...])
    h_new = jnp.maximum(h_new, 0.0)                          # (R, H) f32
    h_scr[...] = h_new.reshape(TB, K, H)                     # carry to t+1

    # ---- Y[t] = sigmoid(dec(cat(max_K z, max_K h))) ------------------------
    zmax = jnp.max(z.reshape(TB, K, D), axis=1)              # (TB, D)
    hmax = jnp.max(h_new.reshape(TB, K, H), axis=1)          # (TB, H)
    logit = (jnp.dot(zmax.astype(bf16), dz_ref[...],
                     preferred_element_type=jnp.float32)
             + jnp.dot(hmax.astype(bf16), dh_ref[...],
                       preferred_element_type=jnp.float32)
             + db_ref[...])                                  # (TB, 1)
    y_ref[...] = jax.nn.sigmoid(logit)


def gnn_forward(e_seq, params, *, tb=None):
    """e_seq: (L, B, K, 2) float32.  Returns Y: (L, B) float32."""
    L, B, K, F = e_seq.shape
    assert F == 2, "GNN.enc expects 2 raw features per node"
    d_enc = params["m1_w"].shape[0]
    d_hid = params["u_w"].shape[0]

    if tb is None:
        tb = B                       # all batch elements per grid step
    assert B % tb == 0
    nb = B // tb

    f32, bf16 = jnp.float32, jnp.bfloat16

    # enc: Linear(2 + H -> D); split cat((E, h)).
    wee = params["enc_w"][:, :F].T.astype(bf16)              # (2, D)
    weh = params["enc_w"][:, F:].T.astype(bf16)              # (H, D)
    be = params["enc_b"].reshape(1, d_enc).astype(f32)

    # M1 | M2 fused into one weight.
    w12 = jnp.concatenate([params["m1_w"].T, params["m2_w"].T],
                          axis=1).astype(bf16)               # (D, 2D)
    b12 = jnp.concatenate([params["m1_b"], params["m2_b"]]
                          ).reshape(1, 2 * d_enc).astype(f32)

    # U: Linear(2D -> H); split cat((z, m)).
    uz = params["u_w"][:, :d_enc].T.astype(bf16)             # (D, H)
    um = params["u_w"][:, d_enc:].T.astype(bf16)             # (D, H)
    ub = params["u_b"].reshape(1, d_hid).astype(f32)

    # dec: Linear(D + H -> 1); split cat((zmax, hmax)).
    dz = params["dec_w"][:, :d_enc].T.astype(bf16)           # (D, 1)
    dh = params["dec_w"][:, d_enc:].T.astype(bf16)           # (H, 1)
    db = params["dec_b"].reshape(1, 1).astype(f32)

    wmap = lambda bi, t: (0, 0)      # weights: constant block -> fetched once

    grid_spec = pltpu.PrefetchScalarGridSpec(
        num_scalar_prefetch=0,
        grid=(nb, L),                # (batch tiles, time)
        in_specs=[
            pl.BlockSpec((pl.Squeezed(), tb, K, F), lambda bi, t: (t, bi, 0, 0)),
            pl.BlockSpec((F, d_enc), wmap),          # enc weight (E part)
            pl.BlockSpec((d_hid, d_enc), wmap),      # enc weight (h part)
            pl.BlockSpec((1, d_enc), wmap),          # enc bias
            pl.BlockSpec((d_enc, 2 * d_enc), wmap),  # fused M1|M2 weight
            pl.BlockSpec((1, 2 * d_enc), wmap),      # fused M1|M2 bias
            pl.BlockSpec((d_enc, d_hid), wmap),      # U weight (z half)
            pl.BlockSpec((d_enc, d_hid), wmap),      # U weight (m half)
            pl.BlockSpec((1, d_hid), wmap),          # U bias
            pl.BlockSpec((d_enc, 1), wmap),          # dec weight (z half)
            pl.BlockSpec((d_hid, 1), wmap),          # dec weight (h half)
            pl.BlockSpec((1, 1), wmap),              # dec bias
        ],
        out_specs=pl.BlockSpec((pl.Squeezed(), tb, 1), lambda bi, t: (t, bi, 0)),
        scratch_shapes=[pltpu.VMEM((tb, K, d_hid), jnp.float32)],  # hidden state
    )

    y3 = pl.pallas_call(
        _gnn_kernel,
        out_shape=jax.ShapeDtypeStruct((L, B, 1), jnp.float32),
        grid_spec=grid_spec,
        compiler_params=pltpu.CompilerParams(
            dimension_semantics=("parallel", "arbitrary")),
    )(e_seq, wee, weh, be, w12, b12, uz, um, ub, dz, dh, db)
    return y3[:, :, 0]


def init_params(key, enc_size, hidden_size):
    """Deterministic synthetic init mirroring nn.Linear (weight (out,in))."""
    def lin(k, fan_in, fan_out):
        kw, kb = jax.random.split(k)
        bound = 1.0 / (fan_in ** 0.5)
        w = jax.random.uniform(kw, (fan_out, fan_in), jnp.float32, -bound, bound)
        b = jax.random.uniform(kb, (fan_out,), jnp.float32, -bound, bound)
        return w, b

    k_enc, k_u, k_m1, k_m2, k_dec = jax.random.split(key, 5)
    enc_w, enc_b = lin(k_enc, 2 + hidden_size, enc_size)     # enc
    u_w, u_b = lin(k_u, 2 * enc_size, hidden_size)           # proc.U
    m1_w, m1_b = lin(k_m1, enc_size, enc_size)               # proc.M1
    m2_w, m2_b = lin(k_m2, enc_size, enc_size)               # proc.M2
    dec_w, dec_b = lin(k_dec, enc_size + hidden_size, 1)     # dec
    # Wq / Wk exist in the torch module but are unused in forward() -> omitted.
    return dict(enc_w=enc_w, enc_b=enc_b, u_w=u_w, u_b=u_b,
                m1_w=m1_w, m1_b=m1_b, m2_w=m2_w, m2_b=m2_b,
                dec_w=dec_w, dec_b=dec_b)


def _reference(e_seq, params):
    """Pure-JAX f32 reference of the PyTorch GNN.forward."""
    L, B, K, _ = e_seq.shape
    d_hid = params["u_w"].shape[0]
    h = jnp.zeros((B, K, d_hid), jnp.float32)
    ys = []
    for t in range(L):
        z = (jnp.concatenate([e_seq[t], h], -1) @ params["enc_w"].T
             + params["enc_b"])
        m1z = z @ params["m1_w"].T + params["m1_b"]
        m2z = z @ params["m2_w"].T + params["m2_b"]
        m = jax.nn.relu(m1z + jnp.max(m2z, axis=1, keepdims=True))
        h = jax.nn.relu(jnp.concatenate([z, m], -1) @ params["u_w"].T
                        + params["u_b"])
        cat = jnp.concatenate([jnp.max(z, axis=1), jnp.max(h, axis=1)], -1)
        ys.append(jax.nn.sigmoid(cat @ params["dec_w"].T + params["dec_b"])[:, 0])
    return jnp.stack(ys)             # (L, B)


if __name__ == "__main__":
    enc_size, hidden_size = 32, 32
    L, B, K = 4, 2, 8

    key = jax.random.PRNGKey(0)
    k_p, k_e = jax.random.split(key)
    params = init_params(k_p, enc_size, hidden_size)
    e_seq = jax.random.normal(k_e, (L, B, K, 2), jnp.float32)

    out = gnn_forward(e_seq, params)
    out = jax.block_until_ready(out)

    ref = _reference(e_seq, params)
    assert out.shape == (L, B)
    err = float(jnp.max(jnp.abs(out - ref)))
    # bf16 matmul operands -> relaxed tolerance vs. the f32 reference.
    assert err < 3e-2, f"max abs err {err}"

    print("KERNEL_OK")
</pallas_src>

<mosaic_0001>
module attributes {stable_mosaic.version = 11 : i64} {
  func.func @_gnn_kernel(%arg0: i32, %arg1: i32, %arg2: memref<1x2x8x2xf32, #tpu.memory_space<vmem>>, %arg3: memref<2x32xbf16, #tpu.memory_space<vmem>>, %arg4: memref<32x32xbf16, #tpu.memory_space<vmem>>, %arg5: memref<1x32xf32, #tpu.memory_space<vmem>>, %arg6: memref<32x64xbf16, #tpu.memory_space<vmem>>, %arg7: memref<1x64xf32, #tpu.memory_space<vmem>>, %arg8: memref<32x32xbf16, #tpu.memory_space<vmem>>, %arg9: memref<32x32xbf16, #tpu.memory_space<vmem>>, %arg10: memref<1x32xf32, #tpu.memory_space<vmem>>, %arg11: memref<32x1xbf16, #tpu.memory_space<vmem>>, %arg12: memref<32x1xbf16, #tpu.memory_space<vmem>>, %arg13: memref<1x1xf32, #tpu.memory_space<vmem>>, %arg14: memref<1x2x1xf32, #tpu.memory_space<vmem>>, %arg15: memref<2x8x32xf32, #tpu.memory_space<vmem>>) attributes {dimension_semantics = [#tpu.dimension_semantics<parallel>, #tpu.dimension_semantics<arbitrary>], iteration_bounds = array<i64: 1, 4>, scalar_prefetch = 0 : i64, scratch_operands = 1 : i64, tpu.core_type = #tpu.core_type<tc>, window_params = [{transform_indices = @transform_0, window_bounds = array<i64: 1, 2, 8, 2>}, {pipeline_mode = #tpu.pipeline_mode<synchronous>, transform_indices = @transform_1, window_bounds = array<i64: 2, 32>}, {pipeline_mode = #tpu.pipeline_mode<synchronous>, transform_indices = @transform_2, window_bounds = array<i64: 32, 32>}, {pipeline_mode = #tpu.pipeline_mode<synchronous>, transform_indices = @transform_3, window_bounds = array<i64: 1, 32>}, {pipeline_mode = #tpu.pipeline_mode<synchronous>, transform_indices = @transform_4, window_bounds = array<i64: 32, 64>}, {pipeline_mode = #tpu.pipeline_mode<synchronous>, transform_indices = @transform_5, window_bounds = array<i64: 1, 64>}, {pipeline_mode = #tpu.pipeline_mode<synchronous>, transform_indices = @transform_6, window_bounds = array<i64: 32, 32>}, {pipeline_mode = #tpu.pipeline_mode<synchronous>, transform_indices = @transform_7, window_bounds = array<i64: 32, 32>}, {pipeline_mode = #tpu.pipeline_mode<synchronous>, transform_indices = @transform_8, window_bounds = array<i64: 1, 32>}, {pipeline_mode = #tpu.pipeline_mode<synchronous>, transform_indices = @transform_9, window_bounds = array<i64: 32, 1>}, {pipeline_mode = #tpu.pipeline_mode<synchronous>, transform_indices = @transform_10, window_bounds = array<i64: 32, 1>}, {pipeline_mode = #tpu.pipeline_mode<synchronous>, transform_indices = @transform_11, window_bounds = array<i64: 1, 1>}, {transform_indices = @transform_12, window_bounds = array<i64: 1, 2, 1>}]} {
    %c0_i32 = arith.constant 0 : i32
    %0 = arith.cmpi eq, %arg1, %c0_i32 : i32
    %1 = arith.extui %0 : i1 to i32
    %c0_i32_0 = arith.constant 0 : i32
    %2 = arith.cmpi ne, %1, %c0_i32_0 : i32
    scf.if %2 {
      %cst_47 = arith.constant 0.000000e+00 : f32
      %70 = vector.broadcast %cst_47 : f32 to vector<2x8x32xf32>
      %c0_48 = arith.constant 0 : index
      %c0_49 = arith.constant 0 : index
      %c0_50 = arith.constant 0 : index
      %71 = vector.load %arg15[%c0_48, %c0_49, %c0_50] : memref<2x8x32xf32, #tpu.memory_space<vmem>>, vector<2x8x32xf32>
      tpu.vector_store %arg15[%c0_48, %c0_49, %c0_50], %70 {strides = array<i32>} : memref<2x8x32xf32, #tpu.memory_space<vmem>>, vector<2x8x32xf32>,
    } else {
    }
    %c0 = arith.constant 0 : index
    %c0_1 = arith.constant 0 : index
    %c0_2 = arith.constant 0 : index
    %c0_3 = arith.constant 0 : index
    %3 = vector.load %arg2[%c0, %c0_1, %c0_2, %c0_3] : memref<1x2x8x2xf32, #tpu.memory_space<vmem>>, vector<1x2x8x2xf32>
    %4 = vector.shape_cast %3 : vector<1x2x8x2xf32> to vector<2x8x2xf32>
    %5 = vector.shape_cast %4 : vector<2x8x2xf32> to vector<16x2xf32>
    %6 = arith.truncf %5 : vector<16x2xf32> to vector<16x2xbf16>
    %c0_4 = arith.constant 0 : index
    %c0_5 = arith.constant 0 : index
    %c0_6 = arith.constant 0 : index
    %7 = vector.load %arg15[%c0_4, %c0_5, %c0_6] : memref<2x8x32xf32, #tpu.memory_space<vmem>>, vector<2x8x32xf32>
    %8 = vector.shape_cast %7 : vector<2x8x32xf32> to vector<16x32xf32>
    %9 = arith.truncf %8 : vector<16x32xf32> to vector<16x32xbf16>
    %c0_7 = arith.constant 0 : index
    %c0_8 = arith.constant 0 : index
    %10 = vector.load %arg3[%c0_7, %c0_8] : memref<2x32xbf16, #tpu.memory_space<vmem>>, vector<2x32xbf16>
    %cst = arith.constant dense<0.000000e+00> : vector<16x32xf32>
    %11 = tpu.matmul %6, %10, %cst {dimension_numbers = #tpu.dot_dimension_numbers<[1], [0], [0], [1], [0, 0, 1, 1], [], []>} : vector<16x2xbf16>, vector<2x32xbf16>, vector<16x32xf32> -> vector<16x32xf32>
    %c0_9 = arith.constant 0 : index
    %c0_10 = arith.constant 0 : index
    %12 = vector.load %arg4[%c0_9, %c0_10] : memref<32x32xbf16, #tpu.memory_space<vmem>>, vector<32x32xbf16>
    %cst_11 = arith.constant dense<0.000000e+00> : vector<16x32xf32>
    %13 = tpu.matmul %9, %12, %cst_11 {dimension_numbers = #tpu.dot_dimension_numbers<[1], [0], [0], [1], [0, 0, 1, 1], [], []>} : vector<16x32xbf16>, vector<32x32xbf16>, vector<16x32xf32> -> vector<16x32xf32>
    %14 = arith.addf %11, %13 : vector<16x32xf32>
    %c0_12 = arith.constant 0 : index
    %c0_13 = arith.constant 0 : index
    %15 = vector.load %arg5[%c0_12, %c0_13] : memref<1x32xf32, #tpu.memory_space<vmem>>, vector<1x32xf32>
    %16 = vector.broadcast %15 : vector<1x32xf32> to vector<16x32xf32>
    %17 = arith.addf %14, %16 : vector<16x32xf32>
    %18 = arith.truncf %17 : vector<16x32xf32> to vector<16x32xbf16>
    %c0_14 = arith.constant 0 : index
    %c0_15 = arith.constant 0 : index
    %19 = vector.load %arg6[%c0_14, %c0_15] : memref<32x64xbf16, #tpu.memory_space<vmem>>, vector<32x64xbf16>
    %cst_16 = arith.constant dense<0.000000e+00> : vector<16x64xf32>
    %20 = tpu.matmul %18, %19, %cst_16 {dimension_numbers = #tpu.dot_dimension_numbers<[1], [0], [0], [1], [0, 0, 1, 1], [], []>} : vector<16x32xbf16>, vector<32x64xbf16>, vector<16x64xf32> -> vector<16x64xf32>
    %c0_17 = arith.constant 0 : index
    %c0_18 = arith.constant 0 : index
    %21 = vector.load %arg7[%c0_17, %c0_18] : memref<1x64xf32, #tpu.memory_space<vmem>>, vector<1x64xf32>
    %22 = vector.broadcast %21 : vector<1x64xf32> to vector<16x64xf32>
    %23 = arith.addf %20, %22 : vector<16x64xf32>
    %24 = vector.extract_strided_slice %23 {offsets = [0, 0], sizes = [16, 32], strides = [1, 1]} : vector<16x64xf32> to vector<16x32xf32>
    %25 = vector.shape_cast %24 : vector<16x32xf32> to vector<2x8x32xf32>
    %26 = vector.extract_strided_slice %23 {offsets = [0, 32], sizes = [16, 32], strides = [1, 1]} : vector<16x64xf32> to vector<16x32xf32>
    %27 = vector.shape_cast %26 : vector<16x32xf32> to vector<2x8x32xf32>
    %cst_19 = arith.constant dense<0xFF800000> : vector<2x32xf32>
    %28 = vector.multi_reduction <maximumf>, %27, %cst_19 [1] : vector<2x8x32xf32> to vector<2x32xf32>
    %29 = vector.shape_cast %28 : vector<2x32xf32> to vector<2x1x32xf32>
    %30 = vector.broadcast %29 : vector<2x1x32xf32> to vector<2x8x32xf32>
    %31 = arith.addf %25, %30 : vector<2x8x32xf32>
    %cst_20 = arith.constant 0.000000e+00 : f32
    %32 = vector.broadcast %cst_20 : f32 to vector<2x8x32xf32>
    %33 = arith.maximumf %31, %32 : vector<2x8x32xf32>
    %34 = vector.shape_cast %33 : vector<2x8x32xf32> to vector<16x32xf32>
    %35 = arith.truncf %34 : vector<16x32xf32> to vector<16x32xbf16>
    %c0_21 = arith.constant 0 : index
    %c0_22 = arith.constant 0 : index
    %36 = vector.load %arg8[%c0_21, %c0_22] : memref<32x32xbf16, #tpu.memory_space<vmem>>, vector<32x32xbf16>
    %cst_23 = arith.constant dense<0.000000e+00> : vector<16x32xf32>
    %37 = tpu.matmul %18, %36, %cst_23 {dimension_numbers = #tpu.dot_dimension_numbers<[1], [0], [0], [1], [0, 0, 1, 1], [], []>} : vector<16x32xbf16>, vector<32x32xbf16>, vector<16x32xf32> -> vector<16x32xf32>
    %c0_24 = arith.constant 0 : index
    %c0_25 = arith.constant 0 : index
    %38 = vector.load %arg9[%c0_24, %c0_25] : memref<32x32xbf16, #tpu.memory_space<vmem>>, vector<32x32xbf16>
    %cst_26 = arith.constant dense<0.000000e+00> : vector<16x32xf32>
    %39 = tpu.matmul %35, %38, %cst_26 {dimension_numbers = #tpu.dot_dimension_numbers<[1], [0], [0], [1], [0, 0, 1, 1], [], []>} : vector<16x32xbf16>, vector<32x32xbf16>, vector<16x32xf32> -> vector<16x32xf32>
    %40 = arith.addf %37, %39 : vector<16x32xf32>
    %c0_27 = arith.constant 0 : index
    %c0_28 = arith.constant 0 : index
    %41 = vector.load %arg10[%c0_27, %c0_28] : memref<1x32xf32, #tpu.memory_space<vmem>>, vector<1x32xf32>
    %42 = vector.broadcast %41 : vector<1x32xf32> to vector<16x32xf32>
    %43 = arith.addf %40, %42 : vector<16x32xf32>
    %cst_29 = arith.constant 0.000000e+00 : f32
    %44 = vector.broadcast %cst_29 : f32 to vector<16x32xf32>
    %45 = arith.maximumf %43, %44 : vector<16x32xf32>
    %46 = vector.shape_cast %45 : vector<16x32xf32> to vector<2x8x32xf32>
    %c0_30 = arith.constant 0 : index
    %c0_31 = arith.constant 0 : index
    %c0_32 = arith.constant 0 : index
    %47 = vector.load %arg15[%c0_30, %c0_31, %c0_32] : memref<2x8x32xf32, #tpu.memory_space<vmem>>, vector<2x8x32xf32>
    tpu.vector_store %arg15[%c0_30, %c0_31, %c0_32], %46 {strides = array<i32>} : memref<2x8x32xf32, #tpu.memory_space<vmem>>, vector<2x8x32xf32>,
    %48 = vector.shape_cast %17 : vector<16x32xf32> to vector<2x8x32xf32>
    %cst_33 = arith.constant dense<0xFF800000> : vector<2x32xf32>
    %49 = vector.multi_reduction <maximumf>, %48, %cst_33 [1] : vector<2x8x32xf32> to vector<2x32xf32>
    %50 = vector.shape_cast %45 : vector<16x32xf32> to vector<2x8x32xf32>
    %cst_34 = arith.constant dense<0xFF800000> : vector<2x32xf32>
    %51 = vector.multi_reduction <maximumf>, %50, %cst_34 [1] : vector<2x8x32xf32> to vector<2x32xf32>
    %52 = arith.truncf %49 : vector<2x32xf32> to vector<2x32xbf16>
    %c0_35 = arith.constant 0 : index
    %c0_36 = arith.constant 0 : index
    %53 = vector.load %arg11[%c0_35, %c0_36] : memref<32x1xbf16, #tpu.memory_space<vmem>>, vector<32x1xbf16>
    %cst_37 = arith.constant dense<0.000000e+00> : vector<2x1xf32>
    %54 = tpu.matmul %52, %53, %cst_37 {dimension_numbers = #tpu.dot_dimension_numbers<[1], [0], [0], [1], [0, 0, 1, 1], [], []>} : vector<2x32xbf16>, vector<32x1xbf16>, vector<2x1xf32> -> vector<2x1xf32>
    %55 = arith.truncf %51 : vector<2x32xf32> to vector<2x32xbf16>
    %c0_38 = arith.constant 0 : index
    %c0_39 = arith.constant 0 : index
    %56 = vector.load %arg12[%c0_38, %c0_39] : memref<32x1xbf16, #tpu.memory_space<vmem>>, vector<32x1xbf16>
    %cst_40 = arith.constant dense<0.000000e+00> : vector<2x1xf32>
    %57 = tpu.matmul %55, %56, %cst_40 {dimension_numbers = #tpu.dot_dimension_numbers<[1], [0], [0], [1], [0, 0, 1, 1], [], []>} : vector<2x32xbf16>, vector<32x1xbf16>, vector<2x1xf32> -> vector<2x1xf32>
    %58 = arith.addf %54, %57 : vector<2x1xf32>
    %c0_41 = arith.constant 0 : index
    %c0_42 = arith.constant 0 : index
    %59 = vector.load %arg13[%c0_41, %c0_42] : memref<1x1xf32, #tpu.memory_space<vmem>>, vector<1x1xf32>
    %60 = vector.broadcast %59 : vector<1x1xf32> to vector<2x1xf32>
    %61 = arith.addf %58, %60 : vector<2x1xf32>
    %62 = arith.negf %61 : vector<2x1xf32>
    %63 = math.exp %62 : vector<2x1xf32>
    %cst_43 = arith.constant 1.000000e+00 : f32
    %64 = vector.broadcast %cst_43 : f32 to vector<2x1xf32>
    %65 = arith.addf %64, %63 : vector<2x1xf32>
    %66 = arith.divf %64, %65 : vector<2x1xf32>
    %c0_44 = arith.constant 0 : index
    %c0_45 = arith.constant 0 : index
    %c0_46 = arith.constant 0 : index
    %67 = vector.load %arg14[%c0_44, %c0_45, %c0_46] : memref<1x2x1xf32, #tpu.memory_space<vmem>>, vector<1x2x1xf32>
    %68 = vector.shape_cast %67 : vector<1x2x1xf32> to vector<2x1xf32>
    %69 = vector.shape_cast %66 : vector<2x1xf32> to vector<1x2x1xf32>
    tpu.vector_store %arg14[%c0_44, %c0_45, %c0_46], %69 {strides = array<i32>} : memref<1x2x1xf32, #tpu.memory_space<vmem>>, vector<1x2x1xf32>,
    return
  }
  func.func @transform_0(%arg0: i32, %arg1: i32) -> (i32, i32, i32, i32) {
    %c0_i32 = arith.constant 0 : i32
    %c0_i32_0 = arith.constant 0 : i32
    %c0_i32_1 = arith.constant 0 : i32
    return %arg1, %arg0, %c0_i32, %c0_i32_0 : i32, i32, i32, i32
  }
  func.func @transform_1(%arg0: i32, %arg1: i32) -> (i32, i32) {
    %c0_i32 = arith.constant 0 : i32
    %c0_i32_0 = arith.constant 0 : i32
    %c0_i32_1 = arith.constant 0 : i32
    return %c0_i32, %c0_i32_0 : i32, i32
  }
  func.func @transform_2(%arg0: i32, %arg1: i32) -> (i32, i32) {
    %c0_i32 = arith.constant 0 : i32
    %c0_i32_0 = arith.constant 0 : i32
    %c0_i32_1 = arith.constant 0 : i32
    return %c0_i32, %c0_i32_0 : i32, i32
  }
  func.func @transform_3(%arg0: i32, %arg1: i32) -> (i32, i32) {
    %c0_i32 = arith.constant 0 : i32
    %c0_i32_0 = arith.constant 0 : i32
    %c0_i32_1 = arith.constant 0 : i32
    return %c0_i32, %c0_i32_0 : i32, i32
  }
  func.func @transform_4(%arg0: i32, %arg1: i32) -> (i32, i32) {
    %c0_i32 = arith.constant 0 : i32
    %c0_i32_0 = arith.constant 0 : i32
    %c0_i32_1 = arith.constant 0 : i32
    return %c0_i32, %c0_i32_0 : i32, i32
  }
  func.func @transform_5(%arg0: i32, %arg1: i32) -> (i32, i32) {
    %c0_i32 = arith.constant 0 : i32
    %c0_i32_0 = arith.constant 0 : i32
    %c0_i32_1 = arith.constant 0 : i32
    return %c0_i32, %c0_i32_0 : i32, i32
  }
  func.func @transform_6(%arg0: i32, %arg1: i32) -> (i32, i32) {
    %c0_i32 = arith.constant 0 : i32
    %c0_i32_0 = arith.constant 0 : i32
    %c0_i32_1 = arith.constant 0 : i32
    return %c0_i32, %c0_i32_0 : i32, i32
  }
  func.func @transform_7(%arg0: i32, %arg1: i32) -> (i32, i32) {
    %c0_i32 = arith.constant 0 : i32
    %c0_i32_0 = arith.constant 0 : i32
    %c0_i32_1 = arith.constant 0 : i32
    return %c0_i32, %c0_i32_0 : i32, i32
  }
  func.func @transform_8(%arg0: i32, %arg1: i32) -> (i32, i32) {
    %c0_i32 = arith.constant 0 : i32
    %c0_i32_0 = arith.constant 0 : i32
    %c0_i32_1 = arith.constant 0 : i32
    return %c0_i32, %c0_i32_0 : i32, i32
  }
  func.func @transform_9(%arg0: i32, %arg1: i32) -> (i32, i32) {
    %c0_i32 = arith.constant 0 : i32
    %c0_i32_0 = arith.constant 0 : i32
    %c0_i32_1 = arith.constant 0 : i32
    return %c0_i32, %c0_i32_0 : i32, i32
  }
  func.func @transform_10(%arg0: i32, %arg1: i32) -> (i32, i32) {
    %c0_i32 = arith.constant 0 : i32
    %c0_i32_0 = arith.constant 0 : i32
    %c0_i32_1 = arith.constant 0 : i32
    return %c0_i32, %c0_i32_0 : i32, i32
  }
  func.func @transform_11(%arg0: i32, %arg1: i32) -> (i32, i32) {
    %c0_i32 = arith.constant 0 : i32
    %c0_i32_0 = arith.constant 0 : i32
    %c0_i32_1 = arith.constant 0 : i32
    return %c0_i32, %c0_i32_0 : i32, i32
  }
  func.func @transform_12(%arg0: i32, %arg1: i32) -> (i32, i32, i32) {
    %c0_i32 = arith.constant 0 : i32
    %c0_i32_0 = arith.constant 0 : i32
    return %arg1, %arg0, %c0_i32 : i32, i32, i32
  }
}

</mosaic_0001>

<bundles_post_ra>
// kernel: tpu_custom_call.1
= control target key start
LH: loop header
LB: loop body
LE: loop exit
PB: predicated region body
PF: predicated region fallthrough
CT: control target
= control target key end

     0   :  { %s1316_s23 = smov 0   ;;  %s1318_s24 = smov 0   ;;  %s1441_s0 = inlined_call_operand.vmem [shape: f32[4,2,8,2], index: 0, kind: input, shape index: {}]   ;;  %s1442_s1 = inlined_call_operand.vmem [shape: bf16[2,32], index: 1, kind: input, shape index: {}]   ;;  %s1443_s2 = inlined_call_operand.vmem [shape: bf16[32,32], index: 2, kind: input, shape index: {}]   ;;  %s1444_s3 = inlined_call_operand.vmem [shape: f32[1,32], index: 3, kind: input, shape index: {}]   ;;  %s1445_s4 = inlined_call_operand.vmem [shape: bf16[32,64], index: 4, kind: input, shape index: {}]   ;;  %s1446_s5 = inlined_call_operand.vmem [shape: f32[1,64], index: 5, kind: input, shape index: {}]   ;;  %s1447_s6 = inlined_call_operand.vmem [shape: bf16[32,32], index: 6, kind: input, shape index: {}]   ;;  %s1448_s7 = inlined_call_operand.vmem [shape: bf16[32,32], index: 7, kind: input, shape index: {}]   ;;  %s1449_s8 = inlined_call_operand.vmem [shape: f32[1,32], index: 8, kind: input, shape index: {}]   ;;  %s1450_s9 = inlined_call_operand.vmem [shape: bf16[32,1], index: 9, kind: input, shape index: {}]   ;;  %s1451_s10 = inlined_call_operand.vmem [shape: bf16[32,1], index: 10, kind: input, shape index: {}]   ;;  %s1452_s11 = inlined_call_operand.<no memory space> [shape: f32[1,1], index: 11, kind: input, shape index: {}]   ;;  %s1453_s12 = inlined_call_operand.vmem [shape: f32[4,2,1], index: 12, kind: output, shape index: {}]  }
   0x1   :  { %v17_v0 = vstv %s1452_s11  ;;  %s1320_s25 = smov 0  }
   0x2   :  { %18 = vst [vmem:[#allocation3] sm:$0x1] %v17_v0 }
   0x3 LB: > { %s33_s11 = sadd.s32 1, %s1238_s24  ;;  %p1070_p0 = scmp.ge.s32.totalorder %s1242_s25, 1  ;;  %s1242_s25 = sphi %s1320_s25, %s24_s25   ;;  %s1238_s24 = sphi %s1318_s24, %s1455_s24   ;;  %s1234_s23 = sphi %s1316_s23, %s1454_s23  }
   0x4   : > { %p34_p1 = scmp.ge.s32.totalorder %s33_s11, 4  ;;  %p385_p2 = scmp.lt.s32.totalorder %s1242_s25, 5 }
   0x6   : > { %s1457_s11 = smov (%p34_p1, %s33_s11), 0  ;;  %p386_p3 = pnand %p1070_p0, %p385_p2 }
   0x7   : > { %p434_p4 = scmp.lt.s32.totalorder (!%p386_p3), %s1234_s23, 3  ;;  %p1074_p5 = scmp.ne.s32.totalorder (!%p386_p3), %s1234_s23, 0 }
   0x8   : > { %389 = sbr.rel (%p386_p3) target bundleno = 1087 (0x43f), region = 68 }
   0xf   : > { %s435_s26 = scalar_select %p434_p4, %s1234_s23, 3 }
  0x10   : > { %454 = sbr.rel (%p1074_p5) target bundleno = 23 (0x17), region = 72  ;;  %vm455_vm0 = vcmask (!%p1074_p5), 261120   ;;  %v1244_v1 = vmov (!%p1074_p5), 0.0  }
  0x11   : > { %s1101_s27 = sshll.u32 %s435_s26, 4  ;;  %s1073_s28 = sshll.u32 %s435_s26, 1  ;;  %456 = vst.msk [vmem:[#allocation2] sm:$0xff] (!%p1074_p5), %vm455_vm0, %v1244_v1  ;;  %457 = vst.msk [vmem:[#allocation2 + $0x8] sm:$0xff] (!%p1074_p5), %vm455_vm0, %v1244_v1 }
  0x12   : > { %s441_s13 = scalar_lea.vmem %s1441_s0, %s1101_s27  ;;  %s1340_s16 = scalar_lea.vmem %s1453_s12, %s1073_s28 }
  0x17 PF: > { %v1204_v2 = vld [vmem:[%s1443_s2] sm:$0xff]   ;;  %v1245_v3 = vmov 0.0   ;;  %vm530_vm1 = vcmask 1040384   ;;  %vm1246_vm2 = vmmov 0   ;;  %v1205_v6 = vld [vmem:[%s1443_s2 + $0x8] sm:$0xff]   ;;  %vm526_vm3 = vcmask 15360  }
  0x18   : > { %1122 = vmatprep.subr.bf16.mxu0 %v1245_v3  ;;  %1130 = vmatprep.subr.bf16.mxu1 %v1245_v3  ;;  %v464_v4 = vld [vmem:[%s1442_s1] sm:$0x1]  ;;  %v459_v8 = vld [vmem:[%s441_s13 + $0x8] sm:$0xff]  ;;  %vm481_vm4 = vcmask 261120   ;;  %vm854_vm5 = vcmask 1041409   ;;  %vm652_vm6 = vcmask 523520  }
  0x19   : > { %1123 = vmatpush3.bf16.msra.mxu0 %v1204_v2  ;;  %v532_v5 = vsel %vm530_vm1, %v464_v4, 0  ;;  %1132 = vmatprep.mubr.msk.bf16.mxu1 %vm1246_vm2, %v1245_v3  ;;  %v458_v7 = vld [vmem:[%s441_s13] sm:$0xff]  ;;  %v462_v10 = vld [vmem:[#allocation2 + $0x8] sm:$0xff]  ;;  %s1247_s30 = smov 96   ;;  %vm987_vm7 = vcmask 1024  }
  0x1a   : > { %1131 = vmatpush3.bf16.msra.mxu1 %v532_v5  ;;  %1124 = vmatprep.subr.bf16.mxu0 %v1245_v3  ;;  %v461_v9 = vld [vmem:[#allocation2] sm:$0xff]  ;;  %v460_v11 = vpack.c.bf16 %v459_v8, %v458_v7  ;;  %v1207_v14 = vld [vmem:[%s1445_s4 + $0x8] sm:$0xff]  }
  0x1b   : > { %1126 = vmatprep.mubr.msk.bf16.mxu0 %vm1246_vm2, %v1245_v3  ;;  %1136 = vmatprep.subr.bf16.mxu1 %v1245_v3  ;;  %v463_v12 = vpack.c.bf16 %v462_v10, %v461_v9  ;;  %v1206_v13 = vld [vmem:[%s1445_s4] sm:$0xff]   ;;  %v1209_v37 = vld [vmem:[%s1447_s6 + $0x8] sm:$0xff]  }
  0x1c   : > { %v1079_v19 = vld [vmem:[%s1444_s3] ss:$0 sm:$0xff]  ;;  %v1211_v47 = vld [vmem:[%s1450_s9 + $0x8] sm:$0xff]  }
  0x1d   : > { %1125 = vmatpush3.bf16.msra.mxu0 %v1205_v6  ;;  %1133 = vmatmul.mubr.msk.bf16.vlgmr.msra.gmra.mrb[0].mxu1 %vm526_vm3, %v460_v11  ;;  %v1208_v30 = vld [vmem:[%s1447_s6] sm:$0xff]   ;;  %v1213_v6 = vld [vmem:[%s1448_s7 + $0x8] sm:$0xff]  }
  0x1e   : > { %1140 = vmatprep.mubr.msk.bf16.mxu1 %vm1246_vm2, %v1245_v3  ;;  %1144 = vmatprep.subr.bf16.mxu0 %v1245_v3  ;;  %v1210_v42 = vld [vmem:[%s1450_s9] sm:$0xff]  }
  0x1f   : > { %1137 = vmatpush3.bf16.msra.mxu1 %v1206_v13  ;;  %v1080_v53 = vld [vmem:[%s1446_s5] ss:$0 sm:$0xff] }
  0x20   : > { %1127 = vmatmul.mubr.msk.bf16.vlgmr.msra.gmra.mrb[0].mxu0 %vm481_vm4, %v463_v12  ;;  %1138 = vmatprep.subr.bf16.mxu1 %v1245_v3  ;;  %v1212_v62 = vld [vmem:[%s1448_s7] sm:$0xff]  }
  0x21   : > { %1148 = vmatprep.mubr.msk.bf16.mxu0 %vm1246_vm2, %v1245_v3  ;;  %1145 = vmatpush3.bf16.msra.mxu0 %v1212_v62 }
  0x22   : > { %1146 = vmatprep.subr.bf16.mxu0 %v1245_v3 }
  0x23   : > { %1139 = vmatpush3.bf16.msra.mxu1 %v1207_v14 }
  0x24   : > { %1152 = vmatprep.subr.bf16.mxu1 %v1245_v3 }
  0x25   : > { %1147 = vmatpush3.bf16.msra.mxu0 %v1213_v6 }
  0x26   : > { %1160 = vmatprep.subr.bf16.mxu0 %v1245_v3 }
  0xf0   : > { %v568_v15 = vpop.f32.mrb[0].mxu1 }
  0xf1   : > { %v1134_v16 = vpop.f32.mrb[1].mxu1 }
  0xf2   : > { %v571_v17 = vpop.f32.mrb[2].mxu1 }
  0xf3   : > { %v519_v18 = vpop.f32.mrb[0].mxu0  ;;  %v1135_v20 = vpop.f32.mrb[3].mxu1 }
  0xf4   : > { %v569_v21 = vadd.f32 %v568_v15, %v519_v18  ;;  %v1128_v22 = vpop.f32.mrb[1].mxu0 }
  0xf5   : > { %v522_v23 = vpop.f32.mrb[2].mxu0 }
  0xf6   : > { %v582_v24 = vadd.f32 %v1079_v19, %v569_v21  ;;  %v572_v25 = vadd.f32 %v571_v17, %v522_v23  ;;  %v1129_v26 = vpop.f32.mrb[3].mxu0 }
  0xf8   : > { %v810_v27 = vsel %vm481_vm4, %v582_v24, -inf  ;;  %v583_v28 = vadd.f32 %v1079_v19, %v572_v25 }
  0xf9   : > { %v811_v29 = vrot.slane %v810_v27, 4 }
  0xfa   : > { %v584_v31 = vpack.c.bf16 %v583_v28, %v582_v24  ;;  %v817_v32 = vsel %vm481_vm4, %v583_v28, -inf  ;;  %v1214_v28 = vld [vmem:[%s1451_s10] sm:$0xff]  }
  0xfb   : > { %v812_v33 = vmax.f32 %v810_v27, %v811_v29  ;;  %v818_v34 = vrot.slane %v817_v32, 4  ;;  %v1215_v29 = vld [vmem:[%s1451_s10 + $0x8] sm:$0xff]  }
  0xfc   : > { %1141 = vmatmul.mubr.msk.bf16.vlgmr.msra.gmra.mrb[4].mxu1 %vm481_vm4, %v584_v31 }
  0xfd   : > { %v813_v35 = vrot.slane %v812_v33, 2  ;;  %v819_v36 = vmax.f32 %v817_v32, %v818_v34  ;;  %1153 = vmatpush3.bf16.msra.mxu1 %v1208_v30  ;;  %1156 = vmatprep.mubr.msk.bf16.mxu1 %vm1246_vm2, %v1245_v3 }
  0xfe   : > { %1154 = vmatprep.subr.bf16.mxu1 %v1245_v3 }
  0xff   : > { %v814_v38 = vmax.f32 %v812_v33, %v813_v35  ;;  %v820_v39 = vrot.slane %v819_v36, 2 }
 0x101   : > { %v815_v40 = vrot.slane %v814_v38, 1  ;;  %v821_v41 = vmax.f32 %v819_v36, %v820_v39  ;;  %1155 = vmatpush3.bf16.msra.mxu1 %v1209_v37 }
 0x102   : > { %1168 = vmatprep.subr.bf16.mxu1 %v1245_v3 }
 0x103   : > { %v816_v43 = vmax.f32 %v814_v38, %v815_v40  ;;  %v822_v44 = vrot.slane %v821_v41, 1 }
 0x104   : > { %1157 = vmatmul.mubr.msk.bf16.vlgmr.msra.gmra.mrb[8].mxu1 %vm481_vm4, %v584_v31  ;;  %v1090_v31 = vld [vmem:[%s1449_s8] ss:$0 sm:$0xff] }
 0x105   : > { %v838_v45 = vpack.c.bf16 %v816_v43, %v816_v43  ;;  %v823_v46 = vmax.f32 %v821_v41, %v822_v44  ;;  %1169 = vmatpush3.bf16.msra.mxu1 %v1210_v42  ;;  %1172 = vmatprep.mubr.msk.bf16.mxu1 %vm1246_vm2, %v1245_v3 }
 0x106   : > { %1170 = vmatprep.subr.bf16.mxu1 %v1245_v3 }
 0x107   : > { %v839_v48 = vpack.c.bf16 %v823_v46, %v823_v46  ;;  %v914_v49 = vunpack.c.l.b16 %v838_v45 }
 0x109   : > { %v915_v50 = vunpack.c.l.b16 %v839_v48  ;;  %1171 = vmatpush3.bf16.msra.mxu1 %v1211_v47 }
 0x10b   : > { %v916_v51 = vsel %vm854_vm5, %v915_v50, %v914_v49 }
 0x10c   : > { %v917_v52 = vpack.c.b16 %v916_v51, %v916_v51 }
 0x10e   : > { %1173 = vmatmul.mubr.msk.bf16.vlgmr.msra.gmra.mrb[12].mxu1 %vm481_vm4, %v917_v52 }
 0x1cf   : > { %v645_v54 = vpop.f32.mrb[4].mxu1 }
 0x1d0   : > { %v646_v55 = vadd.f32 %v1080_v53, %v645_v54  ;;  %v1142_v56 = vpop.f32.mrb[5].mxu1 }
 0x1d1   : > { %v648_v57 = vpop.f32.mrb[6].mxu1 }
 0x1d2   : > { %v653_v58 = vsel %vm652_vm6, %v646_v55, -inf  ;;  %v649_v59 = vadd.f32 %v1080_v53, %v648_v57  ;;  %v1143_v60 = vpop.f32.mrb[7].mxu1 }
 0x1d3   : > { %v654_v61 = vrot.slane %v653_v58, 4 }
 0x1d4   : > { %v660_v63 = vsel %vm652_vm6, %v649_v59, -inf }
 0x1d5   : > { %v655_v0 = vmax.f32 %v653_v58, %v654_v61  ;;  %v661_v1 = vrot.slane %v660_v63, 4  ;;  %v1097_v61 = vld [vmem:[#allocation3] ss:$0 sm:$0xff] }
 0x1d7   : > { %v662_v2 = vmax.f32 %v660_v63, %v661_v1  ;;  %v790_v4 = vpop.f32.mrb[8].mxu1  ;;  %v656_v5 = vrot.slane %v655_v0, 2 }
 0x1d8   : > { %v1158_v7 = vpop.f32.mrb[9].mxu1 }
 0x1d9   : > { %v663_v8 = vrot.slane %v662_v2, 2  ;;  %v793_v9 = vpop.f32.mrb[10].mxu1  ;;  %v657_v10 = vmax.f32 %v655_v0, %v656_v5 }
 0x1da   : > { %v1159_v11 = vpop.f32.mrb[11].mxu1 }
 0x1db   : > { %v664_v12 = vmax.f32 %v662_v2, %v663_v8  ;;  %v658_v13 = vrot.slane %v657_v10, 1 }
 0x1dd   : > { %v659_v14 = vmax.f32 %v657_v10, %v658_v13  ;;  %v665_v15 = vrot.slane %v664_v12, 1 }
 0x1df   : > { %669 = vrot.lane.b32.xlu0 %v659_v14, %s1247_s30  ;;  %v666_v17 = vmax.f32 %v664_v12, %v665_v15 }
 0x1e1   : > { %v967_v16 = vpop.f32.mrb[12].mxu1 }
 0x1e2   : > { %v1174_v18 = vpop.f32.mrb[13].mxu1 }
 0x1e3   : > { %671 = vrot.lane.b32.xlu0 %v666_v17, %s1247_s30  ;;  %v970_v19 = vpop.f32.mrb[14].mxu1 }
 0x1e4   : > { %v1175_v20 = vpop.f32.mrb[15].mxu1 }
 0x251   : > { %v670_v21 = vpop.permute.xlu0 %669 }
 0x252   : > { %v675_v22 = vadd.f32 %v670_v21, %v646_v55 }
 0x254   : > { %v677_v25 = vmax.f32 %v675_v22, 0.0 }
 0x255   : > { %v672_v23 = vpop.permute.xlu0 %671 }
 0x256   : > { %v676_v24 = vadd.f32 %v672_v23, %v649_v59 }
 0x258   : > { %v678_v26 = vmax.f32 %v676_v24, 0.0 }
 0x25a   : > { %v679_v27 = vpack.c.bf16 %v678_v26, %v677_v25 }
 0x25c   : > { %1149 = vmatmul.mubr.msk.bf16.vlgmr.msra.gmra.mrb[4].mxu0 %vm481_vm4, %v679_v27 }
 0x25d   : > { %1164 = vmatprep.mubr.msk.bf16.mxu0 %vm1246_vm2, %v1245_v3  ;;  %1161 = vmatpush3.bf16.msra.mxu0 %v1214_v28 }
 0x25e   : > { %1162 = vmatprep.subr.bf16.mxu0 %v1245_v3 }
 0x261   : > { %1163 = vmatpush3.bf16.msra.mxu0 %v1215_v29 }
 0x32f   : > { %v737_v30 = vpop.f32.mrb[4].mxu0 }
 0x330   : > { %v791_v32 = vadd.f32 %v790_v4, %v737_v30  ;;  %v1150_v33 = vpop.f32.mrb[5].mxu0 }
 0x331   : > { %v740_v34 = vpop.f32.mrb[6].mxu0 }
 0x332   : > { %v804_v35 = vadd.f32 %v1090_v31, %v791_v32  ;;  %v794_v36 = vadd.f32 %v793_v9, %v740_v34  ;;  %v1151_v37 = vpop.f32.mrb[7].mxu0 }
 0x334   : > { %v806_v38 = vmax.f32 %v804_v35, 0.0  ;;  %v805_v39 = vadd.f32 %v1090_v31, %v794_v36 }
 0x336   : > { %808 = vst.msk [vmem:[#allocation2] sm:$0xff] %vm481_vm4, %v806_v38  ;;  %v824_v3 = vsel %vm481_vm4, %v806_v38, -inf  ;;  %v807_v40 = vmax.f32 %v805_v39, 0.0 }
 0x337   : > { %v825_v41 = vrot.slane %v824_v3, 4 }
 0x338   : > { %809 = vst.msk [vmem:[#allocation2 + $0x8] sm:$0xff] %vm481_vm4, %v807_v40  ;;  %v831_v42 = vsel %vm481_vm4, %v807_v40, -inf }
 0x339   : > { %v826_v43 = vmax.f32 %v824_v3, %v825_v41  ;;  %v832_v44 = vrot.slane %v831_v42, 4 }
 0x33b   : > { %v827_v45 = vrot.slane %v826_v43, 2  ;;  %v833_v46 = vmax.f32 %v831_v42, %v832_v44 }
 0x33d   : > { %v828_v47 = vmax.f32 %v826_v43, %v827_v45  ;;  %v834_v48 = vrot.slane %v833_v46, 2 }
 0x33f   : > { %v829_v49 = vrot.slane %v828_v47, 1  ;;  %v835_v50 = vmax.f32 %v833_v46, %v834_v48 }
 0x341   : > { %v830_v51 = vmax.f32 %v828_v47, %v829_v49  ;;  %v836_v52 = vrot.slane %v835_v50, 1 }
 0x343   : > { %v844_v53 = vpack.c.bf16 %v830_v51, %v830_v51  ;;  %v837_v54 = vmax.f32 %v835_v50, %v836_v52 }
 0x345   : > { %v845_v55 = vpack.c.bf16 %v837_v54, %v837_v54  ;;  %v852_v56 = vunpack.c.l.b16 %v844_v53 }
 0x347   : > { %v853_v57 = vunpack.c.l.b16 %v845_v55 }
 0x349   : > { %v855_v58 = vsel %vm854_vm5, %v853_v57, %v852_v56 }
 0x34a   : > { %v856_v59 = vpack.c.b16 %v855_v58, %v855_v58 }
 0x34c   : > { %1165 = vmatmul.mubr.msk.bf16.vlgmr.msra.gmra.mrb[8].mxu0 %vm481_vm4, %v856_v59 }
 0x41f   : > { %v906_v60 = vpop.f32.mrb[8].mxu0 }
 0x420   : > { %v968_v62 = vadd.f32 %v967_v16, %v906_v60  ;;  %v1166_v63 = vpop.f32.mrb[9].mxu0 }
 0x421   : > { %v909_v0 = vpop.f32.mrb[10].mxu0 }
 0x422   : > { %v980_v1 = vadd.f32 %v1097_v61, %v968_v62  ;;  %v1167_v2 = vpop.f32.mrb[11].mxu0 }
 0x424   : > { %v1098_v4 = vmul.f32 -1.442695, %v980_v1 }
 0x426   : > { %1216 = vpow2.f32 %v1098_v4 }
 0x430   : > { %v1217_v5 = vpop.eup %1216 }
 0x431   : > { %v984_v6 = vadd.f32 1.0, %v1217_v5 }
 0x433   : > { %1218 = vrcp.f32 %v984_v6 }
 0x43d   : > { %v1219_v7 = vpop.eup %1218 }
 0x43e   : > { %988 = vst.msk [vmem:[%s1340_s16] sm:$0x3] %vm987_vm7, %v1219_v7 }
 0x43f PF: > { %s24_s25 = sadd.s32 1, %s1242_s25   ;;  %s1454_s23 = smov %s1238_s24 }
 0x440   : > { %p21_p6 = scmp.ge.s32.totalorder %s24_s25, 6   ;;  %s1455_s24 = smov %s1457_s11 }
 0x442   :  { %23 = sbr.rel (!%p21_p6) target bundleno = 3 (0x3), region = 102 }

</bundles_post_ra>
